<compile_context>
chip_gen: v7x
topology: tpu7x:2x2x1
jax: 0.10.0
libtpu: 0.0.40
codegen_flags: <defaults>
</compile_context>

<pallas_src>
import jax
import jax.numpy as jnp
from jax.experimental import pallas as pl
from jax.experimental.pallas import tpu as pltpu


def conv1x1_folded_kernel(w6_ref, w8_ref, x_ref, o_ref):
    # w6_ref / w8_ref: (C, C) 1x1-conv weights.
    # x_ref: (C, TM) lane-dense NCHW-native tile.  o_ref: (C, TM).
    # Fold W6 + W8 + I in-kernel (a handful of free VPU ops), then one GEMM.
    C = w6_ref.shape[0]
    row = jax.lax.broadcasted_iota(jnp.int32, (C, C), 0)
    col = jax.lax.broadcasted_iota(jnp.int32, (C, C), 1)
    eye = (row == col).astype(x_ref.dtype)
    w = w6_ref[...] + w8_ref[...] + eye
    o_ref[...] = jnp.dot(
        w, x_ref[...], preferred_element_type=jnp.float32
    ).astype(o_ref.dtype)


def model_forward(x_nchw, w6, w8, *, vmem_budget_bytes=16 * 1024 * 1024):
    """x_nchw: (N, C, H, W) f32. w6, w8: (C, C, 1, 1) f32 (1x1 conv weights)."""
    N, C, H, W = x_nchw.shape
    M = H * W
    itemsize = jnp.dtype(x_nchw.dtype).itemsize

    # 1x1 conv weights are just (C_out, C_in) matrices (free reshape).
    w6_2d = w6.reshape(C, C)
    w8_2d = w8.reshape(C, C)

    cost = pl.CostEstimate(
        flops=2 * N * M * C * C,
        transcendentals=0,
        bytes_accessed=itemsize * (2 * N * C * M + 2 * C * C),
    )

    # Fast path (this module's shapes): N == 1 and the whole (C, H*W) slab
    # (input + output, no double buffering since there is no grid) fits in
    # VMEM on every generation -> single grid-free step.
    if N == 1 and 2 * C * M * itemsize <= vmem_budget_bytes:
        x2 = x_nchw.reshape(C, M)  # free reshape, no transpose
        out2 = pl.pallas_call(
            conv1x1_folded_kernel,
            out_shape=jax.ShapeDtypeStruct((C, M), x_nchw.dtype),
            cost_estimate=cost,
        )(w6_2d, w8_2d, x2)
        return out2.reshape(N, C, H, W)

    # General fallback (larger N or spatial): tile the lane (spatial) axis,
    # capped so 2 buffers x (in + out) x C x tm stays under the VMEM budget
    # (v7x has only 32 MiB default scoped / 64 MiB physical per TensorCore).
    x3 = x_nchw.reshape(N, C, M)
    tm = M
    for cand in (M, 16384, 8192, 4096, 2048, 1024, 512, 256, 128):
        if M % cand == 0 and 4 * C * cand * itemsize <= vmem_budget_bytes:
            tm = cand
            break
    grid = (N, M // tm)

    out3 = pl.pallas_call(
        conv1x1_folded_kernel,
        out_shape=jax.ShapeDtypeStruct((N, C, M), x_nchw.dtype),
        grid_spec=pltpu.PrefetchScalarGridSpec(
            num_scalar_prefetch=0,
            grid=grid,
            in_specs=[
                pl.BlockSpec((C, C), lambda n, i: (0, 0)),          # W6
                pl.BlockSpec((C, C), lambda n, i: (0, 0)),          # W8
                pl.BlockSpec((None, C, tm), lambda n, i: (n, 0, i)),  # x tile
            ],
            out_specs=pl.BlockSpec((None, C, tm), lambda n, i: (n, 0, i)),
        ),
        compiler_params=pltpu.CompilerParams(
            dimension_semantics=("parallel", "parallel"),
            vmem_limit_bytes=32 * 1024 * 1024,
        ),
        cost_estimate=cost,
    )(w6_2d, w8_2d, x3)
    return out3.reshape(N, C, H, W)


if __name__ == "__main__":
    key = jax.random.PRNGKey(0)
    kx, k6, k8 = jax.random.split(key, 3)

    # Same shapes as the original module's example input.
    x = jax.random.normal(kx, (1, 16, 64, 64), dtype=jnp.float32)
    w6 = jax.random.normal(k6, (16, 16, 1, 1), dtype=jnp.float32)
    w8 = jax.random.normal(k8, (16, 16, 1, 1), dtype=jnp.float32)

    out = jax.block_until_ready(model_forward(x, w6, w8))

    # Pure-JAX reference: v9 = conv1x1(x, W6) + x + conv1x1(x, W8), NCHW.
    ref = (
        jnp.einsum("oc,nchw->nohw", w6[:, :, 0, 0], x)
        + x
        + jnp.einsum("oc,nchw->nohw", w8[:, :, 0, 0], x)
    )
    assert jnp.allclose(out, ref, atol=1e-4, rtol=1e-4), "mismatch vs reference"

    print("KERNEL_OK")
</pallas_src>

<mosaic_0001>
module attributes {stable_mosaic.version = 11 : i64} {
  func.func @conv1x1_folded_kernel(%arg0: memref<16x16xf32, #tpu.memory_space<vmem>>, %arg1: memref<16x16xf32, #tpu.memory_space<vmem>>, %arg2: memref<16x4096xf32, #tpu.memory_space<vmem>>, %arg3: memref<16x4096xf32, #tpu.memory_space<vmem>>) attributes {dimension_semantics = [], scalar_prefetch = 0 : i64, scratch_operands = 0 : i64, tpu.core_type = #tpu.core_type<tc>} {
    %0 = tpu.iota {dimensions = array<i32: 0>} : vector<16x16xi32>
    %1 = tpu.iota {dimensions = array<i32: 1>} : vector<16x16xi32>
    %2 = arith.cmpi eq, %0, %1 : vector<16x16xi32>
    %3 = arith.extui %2 : vector<16x16xi1> to vector<16x16xi32>
    %4 = arith.sitofp %3 : vector<16x16xi32> to vector<16x16xf32>
    %c0 = arith.constant 0 : index
    %c0_0 = arith.constant 0 : index
    %5 = vector.load %arg0[%c0, %c0_0] : memref<16x16xf32, #tpu.memory_space<vmem>>, vector<16x16xf32>
    %c0_1 = arith.constant 0 : index
    %c0_2 = arith.constant 0 : index
    %6 = vector.load %arg1[%c0_1, %c0_2] : memref<16x16xf32, #tpu.memory_space<vmem>>, vector<16x16xf32>
    %7 = arith.addf %5, %6 : vector<16x16xf32>
    %8 = arith.addf %7, %4 : vector<16x16xf32>
    %c0_3 = arith.constant 0 : index
    %c0_4 = arith.constant 0 : index
    %9 = vector.load %arg2[%c0_3, %c0_4] : memref<16x4096xf32, #tpu.memory_space<vmem>>, vector<16x4096xf32>
    %cst = arith.constant dense<0.000000e+00> : vector<16x4096xf32>
    %10 = tpu.matmul %8, %9, %cst {dimension_numbers = #tpu.dot_dimension_numbers<[1], [0], [0], [1], [0, 0, 1, 1], [], []>} : vector<16x16xf32>, vector<16x4096xf32>, vector<16x4096xf32> -> vector<16x4096xf32>
    %c0_5 = arith.constant 0 : index
    %c0_6 = arith.constant 0 : index
    %11 = vector.load %arg3[%c0_5, %c0_6] : memref<16x4096xf32, #tpu.memory_space<vmem>>, vector<16x4096xf32>
    tpu.vector_store %arg3[%c0_5, %c0_6], %10 {strides = array<i32>} : memref<16x4096xf32, #tpu.memory_space<vmem>>, vector<16x4096xf32>,
    return
  }
}

</mosaic_0001>

<bundles_post_ra>
// kernel: tpu_custom_call.1
= control target key start
LH: loop header
LB: loop body
LE: loop exit
PB: predicated region body
PF: predicated region fallthrough
CT: control target
= control target key end

     0   :  { %8 = vsyncpa [#allocation3], 0  ;;  %s1854_s0 = inlined_call_operand.hbm [shape: f32[16,16], index: 0, kind: input, shape index: {}]   ;;  %s1855_s1 = inlined_call_operand.hbm [shape: f32[16,16], index: 1, kind: input, shape index: {}]   ;;  %s1856_s2 = inlined_call_operand.hbm [shape: f32[16,4096], index: 2, kind: input, shape index: {}]   ;;  %s1857_s3 = inlined_call_operand.hbm [shape: f32[16,4096], index: 3, kind: output, shape index: {}]  }
   0x1   :  { %9 = vsyncpa [#allocation6], 0 }
   0x2   :  { %10 = vsyncpa [#allocation4], 0  ;;  %s1661_s12 = smov [#allocation5]   ;;  %s1662_s14 = smov [#allocation2]  }
   0x3   :  { %s28_s13 = sshll.u32 %s1661_s12, 4  ;;  %s16_s15 = sshll.u32 %s1662_s14, 4  ;;  %s29_s13 = int_to_ptr.vmem [resolvable:$true] %s28_s13  ;;  %s1690_s15 = int_to_ptr.vmem [resolvable:$true] %s16_s15 }
   0x4   :  { %s1567_s18 = scalar_lea.hbm %s1855_s1, 256 }
   0x5   :  { %p1568_p0 = scmp.ne.s32.totalorder %s1855_s1, %s1567_s18  ;;  %p1571_p1 = scmp.lt.u32.totalorder %s1567_s18, %s1855_s1 }
   0x7   :  { %p1573_p2 = pnand %p1571_p1, %p1568_p0 }
   0x9   :  { %1576 = shalt.err (!%p1573_p2)
}
   0xa   :  { %s1577_s23 = scalar_lea.vmem %s29_s13, 256  ;;  %p1582_p4 = scmp.lt.s32.totalorder %s29_s13, %s29_s13 }
   0xb   :  { %p1578_p3 = scmp.ne.s32.totalorder %s29_s13, %s1577_s23  ;;  %p1583_p5 = scmp.lt.s32.totalorder %s1577_s23, %s1577_s23 }
   0xd   :  { %p1584_p6 = por %p1583_p5, %p1582_p4 }
   0xf   :  { %p1585_p7 = pnand %p1584_p6, %p1578_p3 }
  0x11   :  { %1588 = shalt.err (!%p1585_p7)
}
  0x12   :  { %s1663_s24 = smov 128   ;;  %s1664_s25 = smov 8  }
  0x13   :  { %34 = dma.hbm_to_vmem [thread:$0]  %s1855_s1, 256, %s29_s13, [#allocation6], %s1663_s24, %s1663_s24, %s1664_s25  }
  0x14   :  { %s1589_s30 = scalar_lea.hbm %s1854_s0, 256 }
  0x15   :  { %p1590_p8 = scmp.ne.s32.totalorder %s1854_s0, %s1589_s30  ;;  %p1593_p9 = scmp.lt.u32.totalorder %s1589_s30, %s1854_s0 }
  0x17   :  { %p1595_p10 = pnand %p1593_p9, %p1590_p8 }
  0x19   :  { %1598 = shalt.err (!%p1595_p10)
}
  0x1a   :  { %s1599_s8 = scalar_lea.vmem %s1690_s15, 256  ;;  %p1604_p12 = scmp.lt.s32.totalorder %s1690_s15, %s1690_s15 }
  0x1b   :  { %p1600_p11 = scmp.ne.s32.totalorder %s1690_s15, %s1599_s8  ;;  %p1605_p13 = scmp.lt.s32.totalorder %s1599_s8, %s1599_s8 }
  0x1d   :  { %p1606_p0 = por %p1605_p13, %p1604_p12 }
  0x1f   :  { %p1607_p1 = pnand %p1606_p0, %p1600_p11 }
  0x21   :  { %1610 = shalt.err (!%p1607_p1)
}
  0x22   :  { %22 = dma.hbm_to_vmem [thread:$0]  %s1854_s0, 256, %s1690_s15, [#allocation3], %s1663_s24, %s1663_s24, %s1664_s25  }
  0x23   :  { %s1665_s10 = smov [#allocation7]   ;;  %s1611_s14 = scalar_lea.hbm %s1856_s2, 8192 }
  0x24   :  { %s40_s11 = sshll.u32 %s1665_s10, 4  ;;  %p1612_p2 = scmp.ne.s32.totalorder %s1856_s2, %s1611_s14  ;;  %s41_s11 = int_to_ptr.vmem [resolvable:$true] %s40_s11 }
  0x25   :  { %p1615_p3 = scmp.lt.u32.totalorder %s1611_s14, %s1856_s2 }
  0x27   :  { %p1617_p4 = pnand %p1615_p3, %p1612_p2 }
  0x29   :  { %1620 = shalt.err (!%p1617_p4)
}
  0x2a   :  { %s1621_s20 = scalar_lea.vmem %s41_s11, 8192  ;;  %p1626_p6 = scmp.lt.s32.totalorder %s41_s11, %s41_s11 }
  0x2b   :  { %p1622_p5 = scmp.ne.s32.totalorder %s41_s11, %s1621_s20  ;;  %p1627_p7 = scmp.lt.s32.totalorder %s1621_s20, %s1621_s20 }
  0x2d   :  { %p1628_p8 = por %p1627_p7, %p1626_p6 }
  0x2f   :  { %p1629_p9 = pnand %p1628_p8, %p1622_p5 }
  0x31   :  { %1632 = shalt.err (!%p1629_p9)
}
  0x32   :  { %s1666_s0 = smov 4096   ;;  %s1667_s15 = smov 256  }
  0x33   :  { %46 = dma.hbm_to_vmem [thread:$0]  %s1856_s2, 8192, %s41_s11, [#allocation6], %s1666_s0, %s1666_s0, %s1667_s15  }
  0x34   :  { %1655 = dma.done.wait [#allocation3], 256  }
  0x35   :  { %1656 = vsyncadd [#allocation3], 4294967040 }
  0x36   :  { %1657 = dma.done.wait [#allocation6], 8448  }
  0x37   :  { %1658 = vsyncadd [#allocation6], 4294958848  ;;  %v56_v0 = vlaneseq  ;;  %v1668_v1 = vmov 0.0   ;;  %v76_v5 = vld [vmem:[#allocation7 + $0x8] sm:$0xff]  ;;  %v78_v7 = vld [vmem:[#allocation7 + $0x18] sm:$0xff]  ;;  %vm139_vm2 = vcmask 130048  }
  0x38   :  { %210 = vmatprep.mubr.f32.mxu0 %v1668_v1  ;;  %287 = vmatprep.mubr.f32.mxu1 %v1668_v1  ;;  %v108_v6 = vld [vmem:[#allocation7 + $0x108] sm:$0xff]  ;;  %v110_v9 = vld [vmem:[#allocation7 + $0x118] sm:$0xff]  ;;  %v75_v10 = vld [vmem:[#allocation7] sm:$0xff]  ;;  %s1669_s2 = smov [#allocation8]  }
  0x39   :  { %v57_v2 = vshrl.u32 %v56_v0, 7  ;;  %v60_v3 = vand.u32 127, %v56_v0  ;;  %v1494_v8 = vpack.c.bf16 %v108_v6, %v76_v5  ;;  %v107_v11 = vld [vmem:[#allocation7 + $0x100] sm:$0xff]  ;;  %v1498_v12 = vpack.c.bf16 %v110_v9, %v78_v7  ;;  %v77_v14 = vld [vmem:[#allocation7 + $0x10] sm:$0xff]  ;;  %v80_v20 = vld [vmem:[#allocation7 + $0x28] sm:$0xff]  ;;  %s1447_s23 = sshll.u32 %s1669_s2, 4  ;;  %s1448_s23 = int_to_ptr.vmem [resolvable:$true] %s1447_s23 }
  0x3a   :  { %v1496_v13 = vpack.c.bf16 %v107_v11, %v75_v10  ;;  %v109_v15 = vld [vmem:[#allocation7 + $0x110] sm:$0xff]  ;;  %v67_v16 = vld [vmem:[#allocation2] sm:$0xff]  ;;  %v112_v21 = vld [vmem:[#allocation7 + $0x128] sm:$0xff]  ;;  %s1633_s24 = scalar_lea.vmem %s1448_s23, 8192  ;;  %p1638_p11 = scmp.lt.s32.totalorder %s1448_s23, %s1448_s23 }
  0x3b   :  { %v58_v4 = vadd.s32 8, %v57_v2  ;;  %vm61_vm0 = vcmp.eq.s32.totalorder %v57_v2, %v60_v3  ;;  %1495 = vmatprep.subr.bf16.mxu0 %v1494_v8  ;;  %v1500_v17 = vpack.c.bf16 %v109_v15, %v77_v14  ;;  %v69_v19 = vld [vmem:[#allocation5] sm:$0xff]  ;;  %1499 = vmatprep.subr.bf16.mxu1 %v1498_v12  ;;  %v1502_v23 = vpack.c.bf16 %v112_v21, %v80_v20  ;;  %v82_v24 = vld [vmem:[#allocation7 + $0x38] sm:$0xff]  ;;  %v79_v26 = vld [vmem:[#allocation7 + $0x20] sm:$0xff]  ;;  %p1634_p10 = scmp.ne.s32.totalorder %s1448_s23, %s1633_s24  ;;  %p1639_p12 = scmp.lt.s32.totalorder %s1633_s24, %s1633_s24 }
  0x3c   :  { %v1460_v18 = vsel %vm61_vm0, 1.0, %v1668_v1  ;;  %1497 = vmatpush1.bf16.msra.mxu0 %v1496_v13  ;;  %v71_v22 = vadd.f32 %v69_v19, %v67_v16  ;;  %v114_v25 = vld [vmem:[#allocation7 + $0x138] sm:$0xff]  ;;  %v111_v28 = vld [vmem:[#allocation7 + $0x120] sm:$0xff]  ;;  %v81_v29 = vld [vmem:[#allocation7 + $0x30] sm:$0xff] }
  0x3d   :  { %vm62_vm1 = vcmp.eq.s32.totalorder %v58_v4, %v60_v3  ;;  %1501 = vmatpush1.bf16.msra.mxu1 %v1500_v17  ;;  %v1506_v27 = vpack.c.bf16 %v114_v25, %v82_v24  ;;  %v113_v30 = vld [vmem:[#allocation7 + $0x130] sm:$0xff]  ;;  %1503 = vmatprep.subr.bf16.mxu0 %v1502_v23  ;;  %v1504_v32 = vpack.c.bf16 %v111_v28, %v79_v26  ;;  %v68_v35 = vld [vmem:[#allocation2 + $0x8] sm:$0xff]  ;;  %v70_v36 = vld [vmem:[#allocation5 + $0x8] sm:$0xff]  ;;  %p1640_p13 = por %p1639_p12, %p1638_p11 }
  0x3e   :  { %v1739_v31 = vadd.f32 %v1460_v18, %v71_v22  ;;  %v1508_v33 = vpack.c.bf16 %v113_v30, %v81_v29  ;;  %v1461_v34 = vsel %vm62_vm1, 1.0, %v1668_v1  ;;  %v84_v37 = vld [vmem:[#allocation7 + $0x48] sm:$0xff]  ;;  %v72_v38 = vadd.f32 %v70_v36, %v68_v35  ;;  %v86_v40 = vld [vmem:[#allocation7 + $0x58] sm:$0xff]  ;;  %v83_v45 = vld [vmem:[#allocation7 + $0x40] sm:$0xff] }
  0x3f   :  { %1507 = vmatprep.subr.bf16.mxu1 %v1506_v27  ;;  %v116_v39 = vld [vmem:[#allocation7 + $0x148] sm:$0xff]  ;;  %v118_v41 = vld [vmem:[#allocation7 + $0x158] sm:$0xff]  ;;  %v115_v46 = vld [vmem:[#allocation7 + $0x140] sm:$0xff]  ;;  %p1641_p0 = pnand %p1640_p13, %p1634_p10 }
  0x40   :  { %1462 = vmatmul.mubr.msk.f32.vlgmr.msra.gmra.mrb[0].mxu0 %vm139_vm2, %v1739_v31  ;;  %1464 = vmatmul.mubr.msk.f32.vlgmr.msra.gmra.mrb[0].mxu1 %vm139_vm2, %v1739_v31  ;;  %v1510_v42 = vpack.c.bf16 %v116_v39, %v84_v37  ;;  %v1514_v43 = vpack.c.bf16 %v118_v41, %v86_v40  ;;  %v1747_v44 = vadd.f32 %v1461_v34, %v72_v38  ;;  %v85_v47 = vld [vmem:[#allocation7 + $0x50] sm:$0xff]  ;;  %v88_v49 = vld [vmem:[#allocation7 + $0x68] sm:$0xff]  ;;  %v90_v51 = vld [vmem:[#allocation7 + $0x78] sm:$0xff] }
  0x41   :  { %1505 = vmatpush1.bf16.msra.mxu0 %v1504_v32  ;;  %1509 = vmatpush1.bf16.msra.mxu1 %v1508_v33  ;;  %v117_v48 = vld [vmem:[#allocation7 + $0x150] sm:$0xff]  ;;  %v120_v50 = vld [vmem:[#allocation7 + $0x168] sm:$0xff]  ;;  %v122_v52 = vld [vmem:[#allocation7 + $0x178] sm:$0xff]  ;;  %v1512_v53 = vpack.c.bf16 %v115_v46, %v83_v45 }
  0x42   :  { %216 = vmatprep.mubr.f32.mxu0 %v1668_v1  ;;  %293 = vmatprep.mubr.f32.mxu1 %v1668_v1  ;;  %v1516_v54 = vpack.c.bf16 %v117_v48, %v85_v47  ;;  %v1518_v55 = vpack.c.bf16 %v120_v50, %v88_v49  ;;  %v1522_v56 = vpack.c.bf16 %v122_v52, %v90_v51  ;;  %v87_v57 = vld [vmem:[#allocation7 + $0x60] sm:$0xff]  ;;  %v89_v59 = vld [vmem:[#allocation7 + $0x70] sm:$0xff]  ;;  %v92_v61 = vld [vmem:[#allocation7 + $0x88] sm:$0xff] }
  0x43   :  { %1511 = vmatprep.subr.bf16.mxu0 %v1510_v42  ;;  %1515 = vmatprep.subr.bf16.mxu1 %v1514_v43  ;;  %v119_v58 = vld [vmem:[#allocation7 + $0x160] sm:$0xff]  ;;  %v121_v60 = vld [vmem:[#allocation7 + $0x170] sm:$0xff]  ;;  %v124_v62 = vld [vmem:[#allocation7 + $0x188] sm:$0xff] }
  0x44   :  { %1463 = vmatmul.mubr.msk.f32.gmra.mrb[2].mxu0 %vm139_vm2, %v1747_v44  ;;  %1465 = vmatmul.mubr.msk.f32.gmra.mrb[2].mxu1 %vm139_vm2, %v1747_v44  ;;  %v94_v63 = vld [vmem:[#allocation7 + $0x98] sm:$0xff]  ;;  %v1520_v2 = vpack.c.bf16 %v119_v58, %v87_v57  ;;  %v1524_v3 = vpack.c.bf16 %v121_v60, %v89_v59  ;;  %v1526_v4 = vpack.c.bf16 %v124_v62, %v92_v61  ;;  %v91_v6 = vld [vmem:[#allocation7 + $0x80] sm:$0xff]  ;;  %v93_v8 = vld [vmem:[#allocation7 + $0x90] sm:$0xff] }
  0x45   :  { %364 = vmatprep.mubr.f32.mxu0 %v1668_v1  ;;  %441 = vmatprep.mubr.f32.mxu1 %v1668_v1  ;;  %v126_v0 = vld [vmem:[#allocation7 + $0x198] sm:$0xff]  ;;  %v123_v7 = vld [vmem:[#allocation7 + $0x180] sm:$0xff]  ;;  %v125_v9 = vld [vmem:[#allocation7 + $0x190] sm:$0xff] }
  0x46   :  { %v1530_v5 = vpack.c.bf16 %v126_v0, %v94_v63  ;;  %v96_v10 = vld [vmem:[#allocation7 + $0xa8] sm:$0xff]  ;;  %v98_v12 = vld [vmem:[#allocation7 + $0xb8] sm:$0xff]  ;;  %v1528_v14 = vpack.c.bf16 %v123_v7, %v91_v6  ;;  %v1532_v15 = vpack.c.bf16 %v125_v9, %v93_v8  ;;  %v95_v18 = vld [vmem:[#allocation7 + $0xa0] sm:$0xff] }
  0x47   :  { %v128_v11 = vld [vmem:[#allocation7 + $0x1a8] sm:$0xff]  ;;  %v130_v13 = vld [vmem:[#allocation7 + $0x1b8] sm:$0xff]  ;;  %v127_v19 = vld [vmem:[#allocation7 + $0x1a0] sm:$0xff] }
  0x48   :  { %1466 = vmatmul.mubr.msk.f32.vlgmr.msra.gmra.mrb[4].mxu0 %vm139_vm2, %v1739_v31  ;;  %1468 = vmatmul.mubr.msk.f32.vlgmr.msra.gmra.mrb[4].mxu1 %vm139_vm2, %v1739_v31  ;;  %v1534_v16 = vpack.c.bf16 %v128_v11, %v96_v10  ;;  %v1538_v17 = vpack.c.bf16 %v130_v13, %v98_v12  ;;  %v97_v20 = vld [vmem:[#allocation7 + $0xb0] sm:$0xff]  ;;  %v100_v22 = vld [vmem:[#allocation7 + $0xc8] sm:$0xff]  ;;  %v102_v24 = vld [vmem:[#allocation7 + $0xd8] sm:$0xff]  ;;  %v1536_v26 = vpack.c.bf16 %v127_v19, %v95_v18 }
  0x49   :  { %1513 = vmatpush1.bf16.msra.mxu0 %v1512_v53  ;;  %1517 = vmatpush1.bf16.msra.mxu1 %v1516_v54  ;;  %v129_v21 = vld [vmem:[#allocation7 + $0x1b0] sm:$0xff]  ;;  %v132_v23 = vld [vmem:[#allocation7 + $0x1c8] sm:$0xff]  ;;  %v134_v25 = vld [vmem:[#allocation7 + $0x1d8] sm:$0xff] }
  0x4a   :  { %370 = vmatprep.mubr.f32.mxu0 %v1668_v1  ;;  %447 = vmatprep.mubr.f32.mxu1 %v1668_v1  ;;  %v1540_v27 = vpack.c.bf16 %v129_v21, %v97_v20  ;;  %v1542_v28 = vpack.c.bf16 %v132_v23, %v100_v22  ;;  %v1546_v29 = vpack.c.bf16 %v134_v25, %v102_v24  ;;  %v99_v30 = vld [vmem:[#allocation7 + $0xc0] sm:$0xff]  ;;  %v101_v33 = vld [vmem:[#allocation7 + $0xd0] sm:$0xff]  ;;  %v104_v35 = vld [vmem:[#allocation7 + $0xe8] sm:$0xff] }
  0x4b   :  { %1519 = vmatprep.subr.bf16.mxu0 %v1518_v55  ;;  %1523 = vmatprep.subr.bf16.mxu1 %v1522_v56  ;;  %v131_v32 = vld [vmem:[#allocation7 + $0x1c0] sm:$0xff]  ;;  %v133_v34 = vld [vmem:[#allocation7 + $0x1d0] sm:$0xff]  ;;  %v136_v36 = vld [vmem:[#allocation7 + $0x1e8] sm:$0xff] }
  0x4c   :  { %1467 = vmatmul.mubr.msk.f32.gmra.mrb[6].mxu0 %vm139_vm2, %v1747_v44  ;;  %1469 = vmatmul.mubr.msk.f32.gmra.mrb[6].mxu1 %vm139_vm2, %v1747_v44  ;;  %v106_v37 = vld [vmem:[#allocation7 + $0xf8] sm:$0xff]  ;;  %v1544_v39 = vpack.c.bf16 %v131_v32, %v99_v30  ;;  %v1548_v40 = vpack.c.bf16 %v133_v34, %v101_v33  ;;  %v1550_v41 = vpack.c.bf16 %v136_v36, %v104_v35  ;;  %v103_v43 = vld [vmem:[#allocation7 + $0xe0] sm:$0xff]  ;;  %v105_v46 = vld [vmem:[#allocation7 + $0xf0] sm:$0xff] }
  0x4d   :  { %518 = vmatprep.mubr.f32.mxu0 %v1668_v1  ;;  %595 = vmatprep.mubr.f32.mxu1 %v1668_v1  ;;  %v138_v38 = vld [vmem:[#allocation7 + $0x1f8] sm:$0xff]  ;;  %v135_v45 = vld [vmem:[#allocation7 + $0x1e0] sm:$0xff]  ;;  %v137_v47 = vld [vmem:[#allocation7 + $0x1f0] sm:$0xff] }
  0x4e   :  { %v1554_v42 = vpack.c.bf16 %v138_v38, %v106_v37  ;;  %v1552_v48 = vpack.c.bf16 %v135_v45, %v103_v43  ;;  %v1556_v49 = vpack.c.bf16 %v137_v47, %v105_v46 }
  0x50   :  { %1470 = vmatmul.mubr.msk.f32.vlgmr.msra.gmra.mrb[8].mxu0 %vm139_vm2, %v1739_v31  ;;  %1472 = vmatmul.mubr.msk.f32.vlgmr.msra.gmra.mrb[8].mxu1 %vm139_vm2, %v1739_v31 }
  0x51   :  { %1521 = vmatpush1.bf16.msra.mxu0 %v1520_v2  ;;  %1525 = vmatpush1.bf16.msra.mxu1 %v1524_v3 }
  0x52   :  { %524 = vmatprep.mubr.f32.mxu0 %v1668_v1  ;;  %601 = vmatprep.mubr.f32.mxu1 %v1668_v1 }
  0x53   :  { %1527 = vmatprep.subr.bf16.mxu0 %v1526_v4  ;;  %1531 = vmatprep.subr.bf16.mxu1 %v1530_v5 }
  0x54   :  { %1471 = vmatmul.mubr.msk.f32.gmra.mrb[10].mxu0 %vm139_vm2, %v1747_v44  ;;  %1473 = vmatmul.mubr.msk.f32.gmra.mrb[10].mxu1 %vm139_vm2, %v1747_v44 }
  0x55   :  { %672 = vmatprep.mubr.f32.mxu0 %v1668_v1  ;;  %749 = vmatprep.mubr.f32.mxu1 %v1668_v1 }
  0x58   :  { %1474 = vmatmul.mubr.msk.f32.vlgmr.msra.gmra.mrb[12].mxu0 %vm139_vm2, %v1739_v31  ;;  %1476 = vmatmul.mubr.msk.f32.vlgmr.msra.gmra.mrb[12].mxu1 %vm139_vm2, %v1739_v31 }
  0x59   :  { %1529 = vmatpush1.bf16.msra.mxu0 %v1528_v14  ;;  %1533 = vmatpush1.bf16.msra.mxu1 %v1532_v15 }
  0x5a   :  { %678 = vmatprep.mubr.f32.mxu0 %v1668_v1  ;;  %755 = vmatprep.mubr.f32.mxu1 %v1668_v1 }
  0x5b   :  { %1535 = vmatprep.subr.bf16.mxu0 %v1534_v16  ;;  %1539 = vmatprep.subr.bf16.mxu1 %v1538_v17 }
  0x5c   :  { %1475 = vmatmul.mubr.msk.f32.gmra.mrb[14].mxu0 %vm139_vm2, %v1747_v44  ;;  %1477 = vmatmul.mubr.msk.f32.gmra.mrb[14].mxu1 %vm139_vm2, %v1747_v44 }
  0x5d   :  { %826 = vmatprep.mubr.f32.mxu0 %v1668_v1  ;;  %903 = vmatprep.mubr.f32.mxu1 %v1668_v1 }
  0x60   :  { %1478 = vmatmul.mubr.msk.f32.vlgmr.msra.gmra.mrb[16].mxu0 %vm139_vm2, %v1739_v31  ;;  %1480 = vmatmul.mubr.msk.f32.vlgmr.msra.gmra.mrb[16].mxu1 %vm139_vm2, %v1739_v31 }
  0x61   :  { %1537 = vmatpush1.bf16.msra.mxu0 %v1536_v26  ;;  %1541 = vmatpush1.bf16.msra.mxu1 %v1540_v27 }
  0x62   :  { %832 = vmatprep.mubr.f32.mxu0 %v1668_v1  ;;  %909 = vmatprep.mubr.f32.mxu1 %v1668_v1 }
  0x63   :  { %1543 = vmatprep.subr.bf16.mxu0 %v1542_v28  ;;  %1547 = vmatprep.subr.bf16.mxu1 %v1546_v29 }
  0x64   :  { %1479 = vmatmul.mubr.msk.f32.gmra.mrb[18].mxu0 %vm139_vm2, %v1747_v44  ;;  %1481 = vmatmul.mubr.msk.f32.gmra.mrb[18].mxu1 %vm139_vm2, %v1747_v44 }
  0x65   :  { %980 = vmatprep.mubr.f32.mxu0 %v1668_v1  ;;  %1057 = vmatprep.mubr.f32.mxu1 %v1668_v1 }
  0x68   :  { %1482 = vmatmul.mubr.msk.f32.vlgmr.msra.gmra.mrb[20].mxu0 %vm139_vm2, %v1739_v31  ;;  %1484 = vmatmul.mubr.msk.f32.vlgmr.msra.gmra.mrb[20].mxu1 %vm139_vm2, %v1739_v31 }
  0x69   :  { %1545 = vmatpush1.bf16.msra.mxu0 %v1544_v39  ;;  %1549 = vmatpush1.bf16.msra.mxu1 %v1548_v40 }
  0x6a   :  { %986 = vmatprep.mubr.f32.mxu0 %v1668_v1  ;;  %1063 = vmatprep.mubr.f32.mxu1 %v1668_v1 }
  0x6b   :  { %1551 = vmatprep.subr.bf16.mxu0 %v1550_v41  ;;  %1555 = vmatprep.subr.bf16.mxu1 %v1554_v42 }
  0x6c   :  { %1483 = vmatmul.mubr.msk.f32.gmra.mrb[22].mxu0 %vm139_vm2, %v1747_v44  ;;  %1485 = vmatmul.mubr.msk.f32.gmra.mrb[22].mxu1 %vm139_vm2, %v1747_v44 }
  0x6d   :  { %1134 = vmatprep.mubr.f32.mxu0 %v1668_v1  ;;  %1211 = vmatprep.mubr.f32.mxu1 %v1668_v1 }
  0x70   :  { %1486 = vmatmul.mubr.msk.f32.vlgmr.msra.gmra.mrb[24].mxu0 %vm139_vm2, %v1739_v31  ;;  %1488 = vmatmul.mubr.msk.f32.vlgmr.msra.gmra.mrb[24].mxu1 %vm139_vm2, %v1739_v31 }
  0x71   :  { %1553 = vmatpush1.bf16.msra.mxu0 %v1552_v48  ;;  %1557 = vmatpush1.bf16.msra.mxu1 %v1556_v49 }
  0x72   :  { %1140 = vmatprep.mubr.f32.mxu0 %v1668_v1  ;;  %1217 = vmatprep.mubr.f32.mxu1 %v1668_v1 }
  0x74   :  { %1487 = vmatmul.mubr.msk.f32.gmra.mrb[26].mxu0 %vm139_vm2, %v1747_v44  ;;  %1489 = vmatmul.mubr.msk.f32.gmra.mrb[26].mxu1 %vm139_vm2, %v1747_v44 }
  0x75   :  { %1288 = vmatprep.mubr.f32.mxu0 %v1668_v1  ;;  %1365 = vmatprep.mubr.f32.mxu1 %v1668_v1 }
  0x78   :  { %1490 = vmatmul.mubr.msk.f32.vlgmr.msra.gmra.mrb[28].mxu0 %vm139_vm2, %v1739_v31  ;;  %1492 = vmatmul.mubr.msk.f32.vlgmr.msra.gmra.mrb[28].mxu1 %vm139_vm2, %v1739_v31 }
  0x79   :  { %1294 = vmatprep.mubr.f32.mxu0 %v1668_v1  ;;  %1371 = vmatprep.mubr.f32.mxu1 %v1668_v1 }
  0x7c   :  { %1491 = vmatmul.mubr.msk.f32.gmra.mrb[30].mxu0 %vm139_vm2, %v1747_v44  ;;  %1493 = vmatmul.mubr.msk.f32.gmra.mrb[30].mxu1 %vm139_vm2, %v1747_v44 }
 0x113   :  { %v212_v50 = vpop.f32.mrb[0].mxu0  ;;  %v289_v51 = vpop.f32.mrb[0].mxu1 }
 0x114   :  { %1378 = vst [vmem:[#allocation8] sm:$0xff] %v212_v50  ;;  %1380 = vst [vmem:[#allocation8 + $0x10] sm:$0xff] %v289_v51  ;;  %v214_v52 = vpop.f32.mrb[1].mxu0  ;;  %v291_v53 = vpop.f32.mrb[1].mxu1 }
 0x115   :  { %1379 = vst [vmem:[#allocation8 + $0x8] sm:$0xff] %v214_v52  ;;  %1381 = vst [vmem:[#allocation8 + $0x18] sm:$0xff] %v291_v53 }
 0x117   :  { %v218_v54 = vpop.f32.mrb[2].mxu0  ;;  %v295_v31 = vpop.f32.mrb[2].mxu1 }
 0x118   :  { %1410 = vst [vmem:[#allocation8 + $0x100] sm:$0xff] %v218_v54  ;;  %1412 = vst [vmem:[#allocation8 + $0x110] sm:$0xff] %v295_v31  ;;  %v220_v55 = vpop.f32.mrb[3].mxu0  ;;  %v297_v1 = vpop.f32.mrb[3].mxu1 }
 0x119   :  { %1411 = vst [vmem:[#allocation8 + $0x108] sm:$0xff] %v220_v55  ;;  %1413 = vst [vmem:[#allocation8 + $0x118] sm:$0xff] %v297_v1 }
 0x11b   :  { %v366_v56 = vpop.f32.mrb[4].mxu0  ;;  %v443_v57 = vpop.f32.mrb[4].mxu1 }
 0x11c   :  { %1382 = vst [vmem:[#allocation8 + $0x20] sm:$0xff] %v366_v56  ;;  %1384 = vst [vmem:[#allocation8 + $0x30] sm:$0xff] %v443_v57  ;;  %v368_v44 = vpop.f32.mrb[5].mxu0  ;;  %v445_v58 = vpop.f32.mrb[5].mxu1 }
 0x11d   :  { %1383 = vst [vmem:[#allocation8 + $0x28] sm:$0xff] %v368_v44  ;;  %1385 = vst [vmem:[#allocation8 + $0x38] sm:$0xff] %v445_v58 }
 0x11f   :  { %v372_v59 = vpop.f32.mrb[6].mxu0  ;;  %v449_v60 = vpop.f32.mrb[6].mxu1 }
 0x120   :  { %1414 = vst [vmem:[#allocation8 + $0x120] sm:$0xff] %v372_v59  ;;  %1416 = vst [vmem:[#allocation8 + $0x130] sm:$0xff] %v449_v60  ;;  %v374_v61 = vpop.f32.mrb[7].mxu0  ;;  %v451_v62 = vpop.f32.mrb[7].mxu1 }
 0x121   :  { %1415 = vst [vmem:[#allocation8 + $0x128] sm:$0xff] %v374_v61  ;;  %1417 = vst [vmem:[#allocation8 + $0x138] sm:$0xff] %v451_v62 }
 0x123   :  { %v520_v63 = vpop.f32.mrb[8].mxu0  ;;  %v597_v0 = vpop.f32.mrb[8].mxu1 }
 0x124   :  { %1386 = vst [vmem:[#allocation8 + $0x40] sm:$0xff] %v520_v63  ;;  %1388 = vst [vmem:[#allocation8 + $0x50] sm:$0xff] %v597_v0  ;;  %v522_v2 = vpop.f32.mrb[9].mxu0  ;;  %v599_v3 = vpop.f32.mrb[9].mxu1 }
 0x125   :  { %1387 = vst [vmem:[#allocation8 + $0x48] sm:$0xff] %v522_v2  ;;  %1389 = vst [vmem:[#allocation8 + $0x58] sm:$0xff] %v599_v3 }
 0x127   :  { %v526_v4 = vpop.f32.mrb[10].mxu0  ;;  %v603_v5 = vpop.f32.mrb[10].mxu1 }
 0x128   :  { %1418 = vst [vmem:[#allocation8 + $0x140] sm:$0xff] %v526_v4  ;;  %1420 = vst [vmem:[#allocation8 + $0x150] sm:$0xff] %v603_v5  ;;  %v528_v6 = vpop.f32.mrb[11].mxu0  ;;  %v605_v7 = vpop.f32.mrb[11].mxu1 }
 0x129   :  { %1419 = vst [vmem:[#allocation8 + $0x148] sm:$0xff] %v528_v6  ;;  %1421 = vst [vmem:[#allocation8 + $0x158] sm:$0xff] %v605_v7 }
 0x12b   :  { %v674_v8 = vpop.f32.mrb[12].mxu0  ;;  %v751_v9 = vpop.f32.mrb[12].mxu1 }
 0x12c   :  { %1390 = vst [vmem:[#allocation8 + $0x60] sm:$0xff] %v674_v8  ;;  %1392 = vst [vmem:[#allocation8 + $0x70] sm:$0xff] %v751_v9  ;;  %v676_v10 = vpop.f32.mrb[13].mxu0  ;;  %v753_v11 = vpop.f32.mrb[13].mxu1 }
 0x12d   :  { %1391 = vst [vmem:[#allocation8 + $0x68] sm:$0xff] %v676_v10  ;;  %1393 = vst [vmem:[#allocation8 + $0x78] sm:$0xff] %v753_v11 }
 0x12f   :  { %v680_v12 = vpop.f32.mrb[14].mxu0  ;;  %v757_v13 = vpop.f32.mrb[14].mxu1 }
 0x130   :  { %1422 = vst [vmem:[#allocation8 + $0x160] sm:$0xff] %v680_v12  ;;  %1424 = vst [vmem:[#allocation8 + $0x170] sm:$0xff] %v757_v13  ;;  %v682_v14 = vpop.f32.mrb[15].mxu0  ;;  %v759_v15 = vpop.f32.mrb[15].mxu1 }
 0x131   :  { %1423 = vst [vmem:[#allocation8 + $0x168] sm:$0xff] %v682_v14  ;;  %1425 = vst [vmem:[#allocation8 + $0x178] sm:$0xff] %v759_v15 }
 0x133   :  { %v828_v16 = vpop.f32.mrb[16].mxu0  ;;  %v905_v17 = vpop.f32.mrb[16].mxu1 }
 0x134   :  { %1394 = vst [vmem:[#allocation8 + $0x80] sm:$0xff] %v828_v16  ;;  %1396 = vst [vmem:[#allocation8 + $0x90] sm:$0xff] %v905_v17  ;;  %v830_v18 = vpop.f32.mrb[17].mxu0  ;;  %v907_v19 = vpop.f32.mrb[17].mxu1 }
 0x135   :  { %1395 = vst [vmem:[#allocation8 + $0x88] sm:$0xff] %v830_v18  ;;  %1397 = vst [vmem:[#allocation8 + $0x98] sm:$0xff] %v907_v19 }
 0x137   :  { %v834_v20 = vpop.f32.mrb[18].mxu0  ;;  %v911_v21 = vpop.f32.mrb[18].mxu1 }
 0x138   :  { %1426 = vst [vmem:[#allocation8 + $0x180] sm:$0xff] %v834_v20  ;;  %1428 = vst [vmem:[#allocation8 + $0x190] sm:$0xff] %v911_v21  ;;  %v836_v22 = vpop.f32.mrb[19].mxu0  ;;  %v913_v23 = vpop.f32.mrb[19].mxu1 }
 0x139   :  { %1427 = vst [vmem:[#allocation8 + $0x188] sm:$0xff] %v836_v22  ;;  %1429 = vst [vmem:[#allocation8 + $0x198] sm:$0xff] %v913_v23 }
 0x13b   :  { %v982_v24 = vpop.f32.mrb[20].mxu0  ;;  %v1059_v25 = vpop.f32.mrb[20].mxu1 }
 0x13c   :  { %1398 = vst [vmem:[#allocation8 + $0xa0] sm:$0xff] %v982_v24  ;;  %1400 = vst [vmem:[#allocation8 + $0xb0] sm:$0xff] %v1059_v25  ;;  %v984_v26 = vpop.f32.mrb[21].mxu0  ;;  %v1061_v27 = vpop.f32.mrb[21].mxu1 }
 0x13d   :  { %1399 = vst [vmem:[#allocation8 + $0xa8] sm:$0xff] %v984_v26  ;;  %1401 = vst [vmem:[#allocation8 + $0xb8] sm:$0xff] %v1061_v27 }
 0x13f   :  { %v988_v28 = vpop.f32.mrb[22].mxu0  ;;  %v1065_v29 = vpop.f32.mrb[22].mxu1 }
 0x140   :  { %1430 = vst [vmem:[#allocation8 + $0x1a0] sm:$0xff] %v988_v28  ;;  %1432 = vst [vmem:[#allocation8 + $0x1b0] sm:$0xff] %v1065_v29  ;;  %v990_v30 = vpop.f32.mrb[23].mxu0  ;;  %v1067_v32 = vpop.f32.mrb[23].mxu1 }
 0x141   :  { %1431 = vst [vmem:[#allocation8 + $0x1a8] sm:$0xff] %v990_v30  ;;  %1433 = vst [vmem:[#allocation8 + $0x1b8] sm:$0xff] %v1067_v32 }
 0x143   :  { %v1136_v33 = vpop.f32.mrb[24].mxu0  ;;  %v1213_v34 = vpop.f32.mrb[24].mxu1 }
 0x144   :  { %1402 = vst [vmem:[#allocation8 + $0xc0] sm:$0xff] %v1136_v33  ;;  %1404 = vst [vmem:[#allocation8 + $0xd0] sm:$0xff] %v1213_v34  ;;  %v1138_v35 = vpop.f32.mrb[25].mxu0  ;;  %v1215_v36 = vpop.f32.mrb[25].mxu1 }
 0x145   :  { %1403 = vst [vmem:[#allocation8 + $0xc8] sm:$0xff] %v1138_v35  ;;  %1405 = vst [vmem:[#allocation8 + $0xd8] sm:$0xff] %v1215_v36 }
 0x147   :  { %v1142_v37 = vpop.f32.mrb[26].mxu0  ;;  %v1219_v38 = vpop.f32.mrb[26].mxu1 }
 0x148   :  { %1434 = vst [vmem:[#allocation8 + $0x1c0] sm:$0xff] %v1142_v37  ;;  %1436 = vst [vmem:[#allocation8 + $0x1d0] sm:$0xff] %v1219_v38  ;;  %v1144_v39 = vpop.f32.mrb[27].mxu0  ;;  %v1221_v40 = vpop.f32.mrb[27].mxu1 }
 0x149   :  { %1435 = vst [vmem:[#allocation8 + $0x1c8] sm:$0xff] %v1144_v39  ;;  %1437 = vst [vmem:[#allocation8 + $0x1d8] sm:$0xff] %v1221_v40 }
 0x14b   :  { %v1290_v41 = vpop.f32.mrb[28].mxu0  ;;  %v1367_v42 = vpop.f32.mrb[28].mxu1 }
 0x14c   :  { %1406 = vst [vmem:[#allocation8 + $0xe0] sm:$0xff] %v1290_v41  ;;  %1408 = vst [vmem:[#allocation8 + $0xf0] sm:$0xff] %v1367_v42  ;;  %v1292_v43 = vpop.f32.mrb[29].mxu0  ;;  %v1369_v45 = vpop.f32.mrb[29].mxu1 }
 0x14d   :  { %1407 = vst [vmem:[#allocation8 + $0xe8] sm:$0xff] %v1292_v43  ;;  %1409 = vst [vmem:[#allocation8 + $0xf8] sm:$0xff] %v1369_v45 }
 0x14f   :  { %v1296_v46 = vpop.f32.mrb[30].mxu0  ;;  %v1373_v47 = vpop.f32.mrb[30].mxu1 }
 0x150   :  { %1438 = vst [vmem:[#allocation8 + $0x1e0] sm:$0xff] %v1296_v46  ;;  %1440 = vst [vmem:[#allocation8 + $0x1f0] sm:$0xff] %v1373_v47  ;;  %v1298_v48 = vpop.f32.mrb[31].mxu0  ;;  %v1375_v49 = vpop.f32.mrb[31].mxu1 }
 0x151   :  { %1439 = vst [vmem:[#allocation8 + $0x1e8] sm:$0xff] %v1298_v48  ;;  %1441 = vst [vmem:[#allocation8 + $0x1f8] sm:$0xff] %v1375_v49 }
 0x152   :  { %1644 = shalt.err (!%p1641_p0)
}
 0x153   :  { %s1645_s27 = scalar_lea.hbm %s1857_s3, 8192 }
 0x154   :  { %p1646_p1 = scmp.ne.s32.totalorder %s1857_s3, %s1645_s27  ;;  %p1649_p2 = scmp.lt.u32.totalorder %s1645_s27, %s1857_s3 }
 0x156   :  { %p1651_p3 = pnand %p1649_p2, %p1646_p1 }
 0x158   :  { %1654 = shalt.err (!%p1651_p3)
}
 0x159   :  { %1453 = dma.vmem_to_hbm [thread:$0]  %s1448_s23, 8192, %s1857_s3, [#allocation4], %s1666_s0, %s1666_s0, %s1667_s15  }
 0x15a   :  { %1659 = dma.done.wait [#allocation4], 8192  }
 0x15b   :  { %1660 = vsyncadd [#allocation4], 4294959104 }
 0x15c   :  { %1457 = vsyncpa [#allocation3], 1 }
 0x15d   :  { %1458 = vsyncpa [#allocation6], 1 }
 0x15e   :  { %1459 = vsyncpa [#allocation4], 1 }

</bundles_post_ra>
